<compile_context>
chip_gen: v7x
topology: tpu7x:2x2x1
jax: 0.10.0
libtpu: 0.0.40
codegen_flags: <defaults>
</compile_context>

<pallas_src>
import random

import numpy as np

import jax
import jax.numpy as jnp
from jax.experimental import pallas as pl
from jax.experimental.pallas import tpu as pltpu


# ----------------------------------------------------------------------------
# Pallas kernel: per-channel scaling of a (1, C, HW_TILE) tile
# ----------------------------------------------------------------------------
def _alpha_scale_kernel(x_ref, scale_ref, o_ref):
    # x_ref:     (1, C, HW_TILE)  activation tile (any float dtype)
    # scale_ref: (C, 1) f32       per-channel scale (constant over the grid)
    # o_ref:     (1, C, HW_TILE)
    x = x_ref[...]
    s = scale_ref[...][None, :, :]           # (1, C, 1) broadcast over lanes
    o_ref[...] = (x * s).astype(o_ref.dtype)


def _vmem_capacity_bytes():
    try:
        return int(pltpu.get_tpu_info().vmem_capacity_bytes)
    except Exception:
        return 64 * 1024 * 1024              # conservative (v7x-sized) fallback


def _choose_hw_tile(C, HW, itemsize):
    """Largest multiple-of-128 divisor of HW whose (1, C, tile) block fits the
    per-generation block budget.  Full HW if HW is not a multiple of 128."""
    if HW % 128 != 0 or HW <= 128:
        return HW                            # full-extent block (always legal)
    vmem = _vmem_capacity_bytes()
    # 2x input + 2x output double buffers per block; cap each block at 4 MiB
    # (~16 MiB of buffers) so every generation's scoped-VMEM limit is safe,
    # and shrink further on small-VMEM parts (v7x: 64 MiB -> 2 MiB blocks).
    block_budget = min(4 * 1024 * 1024, max(1 << 20, vmem // 32))
    max_lanes = max(128, block_budget // max(1, C * itemsize))
    m = HW // 128
    best = 1
    for d in range(1, m + 1):
        if m % d == 0 and 128 * d <= max_lanes:
            best = d
    return 128 * best


def _alpha_scale_pallas(x_ncs, scale_c1, hw_tile=None):
    """x_ncs: (N, C, HW) float; scale_c1: (C, 1) float32.  Returns scaled x."""
    N, C, HW = x_ncs.shape
    if hw_tile is None:
        hw_tile = _choose_hw_tile(C, HW, x_ncs.dtype.itemsize)
    assert HW % hw_tile == 0
    n_hw = HW // hw_tile
    return pl.pallas_call(
        _alpha_scale_kernel,
        out_shape=jax.ShapeDtypeStruct((N, C, HW), x_ncs.dtype),
        grid=(N, n_hw),
        in_specs=[
            pl.BlockSpec((1, C, hw_tile), lambda n, h: (n, 0, h)),
            pl.BlockSpec((C, 1), lambda n, h: (0, 0)),   # fetched once
        ],
        out_specs=pl.BlockSpec((1, C, hw_tile), lambda n, h: (n, 0, h)),
        input_output_aliases={0: 0},          # x (operand 0) -> output 0
        compiler_params=pltpu.CompilerParams(
            dimension_semantics=("parallel", "parallel"),
            vmem_limit_bytes=32 * 1024 * 1024,
        ),
    )(x_ncs, scale_c1)


# ----------------------------------------------------------------------------
# AlphaLayer (JAX): parameter setup + glue; forward calls the Pallas kernel
# ----------------------------------------------------------------------------
def make_divisible1(x, kernel_size=1, divisor=32, min_value=None):
    kernel_size1 = kernel_size[0] if isinstance(kernel_size, tuple) else kernel_size
    if min_value is None:
        min_value = divisor
    max_cin_next = 4096 // (kernel_size1 * kernel_size1)
    if x > max_cin_next:
        x = max_cin_next
    new_v = max(min_value, int(x + divisor / 2) // divisor * divisor)
    if new_v < 0.9 * x:
        new_v += divisor
    return int(new_v)


class AlphaLayer:
    def __init__(self, channels, min_width, max_width, offset, prob_type="exp"):
        assert prob_type in ["exp", "sigmoid"]
        self.prob_type = prob_type
        self.channels = channels
        ch_indice = self._get_ch_indice(min_width, max_width, offset, channels)
        self.min_ch = ch_indice[0]
        for i in range(1, len(ch_indice) - 1):
            assert ch_indice[i + 1] - ch_indice[i] == ch_indice[i] - ch_indice[i - 1]
        self.num_groups = len(ch_indice) - 1
        self.group_size = ch_indice[1] - ch_indice[0] if self.num_groups > 0 else 0
        assert self.group_size * self.num_groups + self.min_ch == channels
        self.alpha0 = jnp.ones((1,), jnp.float32)
        if self.num_groups > 0:
            # torch init is zeros; we use a small deterministic ramp so the
            # scaling is visibly non-trivial in the test.
            self.alpha = jnp.arange(self.num_groups, dtype=jnp.float32) * 0.1
        else:
            self.alpha = None

    @staticmethod
    def _get_ch_indice(min_width, max_width, width_offset, max_ch):
        ch_offset = int(width_offset * max_ch / max_width)
        num_offset = int((max_width - min_width) / width_offset + 0.0001)
        min_ch = max_ch - ch_offset * num_offset
        assert min_ch > 0
        indice = []
        for i in range(num_offset + 1):
            indice.append(min_ch + i * ch_offset)
        assert indice[0] == min_ch
        assert indice[-1] == max_ch
        return sorted(list(set(indice)))

    def get_condition_prob(self):
        if self.prob_type == "exp":
            a = jnp.maximum(self.alpha, 0.0)   # jnp.clip(a_min=...) is removed in new JAX
            return jnp.exp(-a)
        return jax.nn.sigmoid(self.alpha)

    def get_marginal_prob(self):
        return jnp.cumprod(self.get_condition_prob(), axis=0)

    # --- host-side utilities kept for module fidelity (no kernel needed) ---
    def expected_channel(self):
        if self.num_groups == 0:
            return make_divisible1(self.min_ch)
        marginal_prob = self.get_marginal_prob()
        return make_divisible1(float(jnp.sum(marginal_prob)) * self.group_size + self.min_ch)

    def direct_sampling(self):
        if self.num_groups == 0:
            return make_divisible1(self.min_ch)
        prob = np.asarray(self.get_condition_prob())
        pruned_ch = self.min_ch
        for i in range(self.num_groups):
            if random.uniform(0, 1) > prob[i]:
                break
            pruned_ch += self.group_size
        return make_divisible1(pruned_ch)

    def expected_sampling(self):
        expected = round(self.expected_channel() - 0.0001)
        candidate = [self.min_ch + self.group_size * i for i in range(self.num_groups + 1)]
        idx = int(np.argmin([abs(ch - expected) for ch in candidate]))
        return (candidate[idx], expected)

    # --- forward pass: the Pallas kernel does the hot per-channel multiply ---
    def forward(self, x):
        # x: (N, C, H, W), NCHW like the PyTorch module.
        N, C, H, W = x.shape
        min_ch = self.min_ch
        if self.num_groups == 0 or C == min_ch:
            return x
        num_groups = min(self.num_groups, (C - min_ch) // self.group_size)
        if num_groups == 0:
            return x

        prob = self.get_marginal_prob()[:num_groups]          # (num_groups,)
        scaled_ch = num_groups * self.group_size
        scale = jnp.concatenate([
            jnp.ones((min_ch,), jnp.float32),
            jnp.repeat(prob.astype(jnp.float32), self.group_size),
            jnp.ones((C - min_ch - scaled_ch,), jnp.float32),
        ]).reshape(C, 1)

        x_flat = x.reshape(N, C, H * W)
        y_flat = _alpha_scale_pallas(x_flat, scale)
        return y_flat.reshape(N, C, H, W)


# ----------------------------------------------------------------------------
if __name__ == "__main__":
    # channels=16, min_width=0.5, max_width=1.0, offset=0.25
    #   -> ch_indice = [8, 12, 16], min_ch = 8, num_groups = 2, group_size = 4
    layer = AlphaLayer(channels=16, min_width=0.5, max_width=1.0, offset=0.25,
                       prob_type="sigmoid")

    key = jax.random.PRNGKey(0)
    # H*W = 256 (multiple of 128) -> lane-dense, unmasked stores.
    x = jax.random.normal(key, (2, 16, 16, 16), dtype=jnp.float32)

    y = jax.block_until_ready(layer.forward(x))

    # Plain-JAX reference.
    prob = layer.get_marginal_prob()
    scale_ref = jnp.concatenate(
        [jnp.ones((layer.min_ch,), jnp.float32),
         jnp.repeat(prob, layer.group_size)]).reshape(1, 16, 1, 1)
    y_ref = x * scale_ref
    assert jnp.allclose(y, y_ref, atol=1e-6), "mismatch vs reference"

    # Also exercise the lane-tiled path explicitly: HW = 1024 split into
    # 256-lane blocks -> grid (2, 4).
    x2 = jax.random.normal(jax.random.PRNGKey(1), (2, 16, 32, 32), dtype=jnp.float32)
    scale2 = jnp.concatenate(
        [jnp.ones((layer.min_ch,), jnp.float32),
         jnp.repeat(prob, layer.group_size)]).reshape(16, 1)
    y2 = jax.block_until_ready(
        _alpha_scale_pallas(x2.reshape(2, 16, 32 * 32), scale2, hw_tile=256)
    ).reshape(2, 16, 32, 32)
    y2_ref = x2 * scale_ref
    assert jnp.allclose(y2, y2_ref, atol=1e-6), "mismatch vs reference (tiled)"

    print("KERNEL_OK")
</pallas_src>

<mosaic_0001>
module attributes {stable_mosaic.version = 11 : i64} {
  func.func @_alpha_scale_kernel(%arg0: i32, %arg1: i32, %arg2: memref<1x16x256xf32, #tpu.memory_space<vmem>>, %arg3: memref<16x1xf32, #tpu.memory_space<vmem>>, %arg4: memref<1x16x256xf32, #tpu.memory_space<vmem>>) attributes {dimension_semantics = [#tpu.dimension_semantics<parallel>, #tpu.dimension_semantics<parallel>], iteration_bounds = array<i64: 2, 1>, scalar_prefetch = 0 : i64, scratch_operands = 0 : i64, tpu.core_type = #tpu.core_type<tc>, window_params = [{transform_indices = @transform_0, window_bounds = array<i64: 1, 16, 256>}, {pipeline_mode = #tpu.pipeline_mode<synchronous>, transform_indices = @transform_1, window_bounds = array<i64: 16, 1>}, {transform_indices = @transform_2, window_bounds = array<i64: 1, 16, 256>}]} {
    %c0 = arith.constant 0 : index
    %c0_0 = arith.constant 0 : index
    %c0_1 = arith.constant 0 : index
    %0 = vector.load %arg2[%c0, %c0_0, %c0_1] : memref<1x16x256xf32, #tpu.memory_space<vmem>>, vector<1x16x256xf32>
    %c0_2 = arith.constant 0 : index
    %c0_3 = arith.constant 0 : index
    %1 = vector.load %arg3[%c0_2, %c0_3] : memref<16x1xf32, #tpu.memory_space<vmem>>, vector<16x1xf32>
    %2 = vector.shape_cast %1 : vector<16x1xf32> to vector<1x16x1xf32>
    %3 = vector.broadcast %2 : vector<1x16x1xf32> to vector<1x16x256xf32>
    %4 = arith.mulf %0, %3 : vector<1x16x256xf32>
    %c0_4 = arith.constant 0 : index
    %c0_5 = arith.constant 0 : index
    %c0_6 = arith.constant 0 : index
    %5 = vector.load %arg4[%c0_4, %c0_5, %c0_6] : memref<1x16x256xf32, #tpu.memory_space<vmem>>, vector<1x16x256xf32>
    tpu.vector_store %arg4[%c0_4, %c0_5, %c0_6], %4 {strides = array<i32>} : memref<1x16x256xf32, #tpu.memory_space<vmem>>, vector<1x16x256xf32>,
    return
  }
  func.func @transform_0(%arg0: i32, %arg1: i32) -> (i32, i32, i32) {
    %c0_i32 = arith.constant 0 : i32
    %c0_i32_0 = arith.constant 0 : i32
    return %arg0, %c0_i32, %arg1 : i32, i32, i32
  }
  func.func @transform_1(%arg0: i32, %arg1: i32) -> (i32, i32) {
    %c0_i32 = arith.constant 0 : i32
    %c0_i32_0 = arith.constant 0 : i32
    %c0_i32_1 = arith.constant 0 : i32
    return %c0_i32, %c0_i32_0 : i32, i32
  }
  func.func @transform_2(%arg0: i32, %arg1: i32) -> (i32, i32, i32) {
    %c0_i32 = arith.constant 0 : i32
    %c0_i32_0 = arith.constant 0 : i32
    return %arg0, %c0_i32, %arg1 : i32, i32, i32
  }
}

</mosaic_0001>

<bundles_post_ra>
// kernel: tpu_custom_call.1
= control target key start
LH: loop header
LB: loop body
LE: loop exit
PB: predicated region body
PF: predicated region fallthrough
CT: control target
= control target key end

     0   :  { %7 = vsyncpa [#allocation3], 0  ;;  %s711_s0 = inlined_call_operand.hbm [shape: f32[2,16,256], index: 0, kind: input, shape index: {}, may-alias: {0,2}]   ;;  %s712_s1 = inlined_call_operand.vmem [shape: f32[16,1], index: 1, kind: input, shape index: {}]   ;;  %s713_s2 = inlined_call_operand.hbm [shape: f32[2,16,256], index: 2, kind: output, shape index: {}, may-alias: {0,2}]  }
   0x1   :  { %9 = vsyncpa [#allocation3 + $0x1], 0 }
   0x2   :  { %10 = vsyncpa [#allocation4], 0 }
   0x3   :  { %12 = vsyncpa [#allocation4 + $0x1], 0  ;;  %s530_s9 = smov 0   ;;  %s532_s10 = smov 0  }
   0x4   :  { %s534_s11 = smov 0   ;;  %s536_s12 = smov 0  }
   0x5   :  { %s538_s13 = smov 0   ;;  %s540_s14 = smov 0  }
   0x6 LB: > { %s309_s15 = sadd.s32 4294967295, %s506_s14   ;;  %s310_s16 = sadd.s32 4294967294, %s506_s14   ;;  %s506_s14 = sphi %s540_s14, %s18_s14   ;;  %s502_s13 = sphi %s538_s13, %s728_s13   ;;  %s498_s12 = sphi %s536_s12, %s727_s12   ;;  %s494_s11 = sphi %s534_s11, %s726_s11   ;;  %s490_s10 = sphi %s532_s10, %s725_s10   ;;  %s486_s9 = sphi %s530_s9, %s724_s9  }
   0x7   : > { %s30_s17 = sadd.s32 1, %s502_s13  ;;  %s39_s18 = sadd.s32 1, %s494_s11 }
   0x8   : > { %p32_p0 = scmp.ge.s32.totalorder %s30_s17, 2  ;;  %p46_p1 = scmp.ne.s32.totalorder %s494_s11, %s490_s10 }
   0x9   : > { %p47_p2 = scmp.eq.s32.totalorder %s506_s14, 0  ;;  %p52_p3 = scmp.ne.s32.totalorder %s490_s10, %s486_s9 }
   0xa   : > { %s730_s17 = smov (%p32_p0, %s30_s17), 0  ;;  %p53_p5 = scmp.eq.s32.totalorder %s309_s15, 0 }
   0xb   : > { %p571_p4 = por %p47_p2, %p46_p1  ;;  %s34_s20 = ssub.s32 %s502_s13, %s730_s17 }
   0xc   : > { %p99_p6 = scmp.eq.s32.totalorder %s309_s15, 1  ;;  %p37_p7 = scmp.eq.s32.totalorder %s34_s20, 0 }
   0xd   : > { %p577_p8 = por %p53_p5, %p52_p3  ;;  %p105_p10 = scmp.eq.s32.totalorder %s310_s16, 1 }
   0xe   : > { %p581_p9 = por %p99_p6, %p46_p1  ;;  %p338_p13 = scmp.lt.s32.totalorder %s506_s14, 2 }
   0xf   : > { %s586_s23 = scalar_select %p37_p7, %s494_s11, %s39_s18  }
  0x10   : > { %s717_s22 = scalar_select %p581_p9, 1, 0 }
  0x11   : > { %p588_p11 = por %p105_p10, %p52_p3  ;;  %s128_s25 = sand.u32 1, %s494_s11  }
  0x12   : > { %s313_s26 = sshll.u32 %s128_s25, 5  ;;  %s324_s27 = sshll.u32 %s502_s13, 9 }
  0x13   : > { %s718_s24 = scalar_select %p588_p11, 1, 0 }
  0x14   : > { %s599_s30 = scalar_lea.hbm %s711_s0, %s324_s27  ;;  %s132_s3 = scalar_lea.vmem [#allocation2], %s313_s26 }
  0x15   : > { %s141_s4 = sshll.u32 %s132_s3, 4  ;;  %p605_p0 = pnand %p338_p13, %p571_p4  ;;  %s601_s4 = int_to_ptr.vmem [resolvable:$true] %s141_s4 }
  0x16   : > { %s610_s6 = scalar_lea.sflag [#allocation3], %s128_s25  ;;  %s394_s7 = scalar_lea.hbm %s599_s30, 512 }
  0x17   : > { %p395_p2 = scmp.ne.s32.totalorder %s599_s30, %s394_s7  ;;  %p396_p3 = pneg %p605_p0 }
  0x18   : > { %s399_s16 = scalar_lea.hbm %s711_s0, 1024  ;;  %p400_p4 = scmp.lt.u32.totalorder %s599_s30, %s711_s0 }
  0x19   : > { %p397_p5 = pnand %p396_p3, %p395_p2  ;;  %p401_p7 = scmp.lt.u32.totalorder %s399_s16, %s394_s7 }
  0x1a   : > { %p403_p13 = scmp.lt.u32.totalorder %s394_s7, %s599_s30 }
  0x1b   : > { %p398_p6 = pneg %p397_p5  ;;  %p402_p10 = por %p401_p7, %p400_p4 }
  0x1d   : > { %p404_p12 = por %p403_p13, %p402_p10 }
  0x1f   : > { %p405_p1 = pnand %p404_p12, %p398_p6 }
  0x21   : > { %408 = shalt.err (!%p405_p1)
}
  0x22   : > { %s409_s20 = scalar_lea.vmem %s601_s4, 512  ;;  %s508_s25 = smov [#allocation2]  }
  0x23   : > { %p410_p2 = scmp.ne.s32.totalorder %s601_s4, %s409_s20  ;;  %s414_s26 = sshll.u32 %s508_s25, 4  ;;  %s415_s26 = int_to_ptr.vmem [resolvable:$false] %s414_s26 }
  0x24   : > { %s416_s27 = scalar_lea.vmem %s415_s26, 1024  ;;  %p417_p9 = scmp.lt.s32.totalorder %s601_s4, %s415_s26 }
  0x25   : > { %p412_p5 = pnand %p410_p2, %p396_p3  ;;  %p418_p4 = scmp.lt.s32.totalorder %s416_s27, %s409_s20 }
  0x27   : > { %p413_p11 = pneg %p412_p5  ;;  %p419_p7 = por %p418_p4, %p417_p9 }
  0x29   : > { %p420_p10 = pnand %p419_p7, %p413_p11 }
  0x2b   : > { %423 = shalt.err (!%p420_p10)
}
  0x2c   : > { %s509_s28 = smov 256   ;;  %s510_s29 = smov 16  }
  0x2d   : > { %333 = dma.hbm_to_vmem [thread:$0]  (!%p605_p0), %s599_s30, 512, %s601_s4, %s610_s6, %s509_s28, %s509_s28, %s510_s29  }
  0x2e   : > { %p149_p12 = scmp.lt.s32.totalorder %s506_s14, 3  ;;  %p720_p1 = scmp.ge.s32.totalorder %s506_s14, 1 }
  0x30   : > { %p150_p3 = pnand %p720_p1, %p149_p12 }
  0x31   : > { %s642_s3 = sand.u32 (!%p150_p3), 1, %s490_s10  }
  0x32   : > { %153 = sbr.rel (%p150_p3) target bundleno = 209 (0xd1), region = 28  ;;  %s317_s7 = sshll.u32 (!%p150_p3), %s642_s3, 5 }
  0x33   : > { %s156_s8 = scalar_lea.sflag (!%p150_p3), [#allocation3], %s642_s3  ;;  %s159_s15 = scalar_lea.vmem (!%p150_p3), [#allocation2], %s317_s7 }
  0x39   : > { %477 = dma.done.wait (%p577_p8), %s156_s8, 512  }
  0x3a   : > { %479 = vsyncadd (%p577_p8), %s156_s8, 4294966784  ;;  %v511_v0 = vmov 0   ;;  %v186_v1 = vld [vmem:[%s712_s1] sm:$0xff]  ;;  %v187_v2 = vld [vmem:[%s712_s1 + $0x8] sm:$0xff]  ;;  %s179_s16 = scalar_lea.vmem [#allocation5], %s317_s7  ;;  %s325_s21 = sshll.u32 %s498_s12, 9 }
  0x3b   : > { %393 = vset.pattern.permute.xlu0 %v511_v0  ;;  %v182_v3 = vld [vmem:[%s159_s15] sm:$0xff]  ;;  %v183_v4 = vld [vmem:[%s159_s15 + $0x8] sm:$0xff]  ;;  %s222_s18 = sshll.u32 %s179_s16, 4  ;;  %v184_v8 = vld [vmem:[%s159_s15 + $0x10] sm:$0xff]  ;;  %s662_s25 = scalar_lea.hbm %s713_s2, %s325_s21  ;;  %s657_s18 = int_to_ptr.vmem [resolvable:$true] %s222_s18 }
  0x3c   : > { %190 = vperm.xlu0 %393, %v186_v1   ;;  %v185_v9 = vld [vmem:[%s159_s15 + $0x18] sm:$0xff]  ;;  %s207_s12 = scalar_lea.sflag [#allocation4], %s642_s3  ;;  %s424_s26 = scalar_lea.vmem %s657_s18, 512 }
  0x3d   : > { %p425_p8 = scmp.ne.s32.totalorder %s657_s18, %s424_s26  ;;  %p721_p9 = scmp.ne.s32.totalorder %s717_s22, 0 }
  0x3e   : > { %s512_s27 = smov [#allocation5]  }
  0x3f   : > { %p426_p11 = pnand %p425_p8, %p721_p9  ;;  %s428_s28 = sshll.u32 %s512_s27, 4  ;;  %s429_s28 = int_to_ptr.vmem [resolvable:$false] %s428_s28 }
  0x40   : > { %195 = vperm.xlu0 %393, %v187_v2   ;;  %s430_s29 = scalar_lea.vmem %s429_s28, 1024  ;;  %p431_p6 = scmp.lt.s32.totalorder %s657_s18, %s429_s28 }
  0x41   : > { %p427_p0 = pneg %p426_p11  ;;  %p432_p13 = scmp.lt.s32.totalorder %s430_s29, %s424_s26 }
  0x43   : > { %p433_p2 = por %p432_p13, %p431_p6 }
  0x45   : > { %p434_p5 = pnand %p433_p2, %p427_p0 }
  0xbb   : > { %v191_v5 = vpop.permute.xlu0 %190 }
  0xbc   : > { %v198_v6 = vmul.f32 %v191_v5, %v182_v3  ;;  %v199_v7 = vmul.f32 %v191_v5, %v183_v4 }
  0xbe   : > { %202 = vst [vmem:[%s179_s16] sm:$0xff] %v198_v6  ;;  %203 = vst [vmem:[%s179_s16 + $0x8] sm:$0xff] %v199_v7 }
  0xbf   : > { %v196_v10 = vpop.permute.xlu0 %195 }
  0xc0   : > { %v200_v11 = vmul.f32 %v196_v10, %v184_v8  ;;  %v201_v12 = vmul.f32 %v196_v10, %v185_v9 }
  0xc2   : > { %204 = vst [vmem:[%s179_s16 + $0x10] sm:$0xff] %v200_v11  ;;  %205 = vst [vmem:[%s179_s16 + $0x18] sm:$0xff] %v201_v12 }
  0xc3   : > { %437 = shalt.err (!%p434_p5)
}
  0xc4   : > { %s438_s7 = scalar_lea.hbm %s662_s25, 512  ;;  %s442_s30 = scalar_lea.hbm %s713_s2, 1024 }
  0xc5   : > { %p439_p4 = scmp.ne.s32.totalorder %s662_s25, %s438_s7  ;;  %p443_p12 = scmp.lt.u32.totalorder %s662_s25, %s713_s2 }
  0xc6   : > { %p444_p1 = scmp.lt.u32.totalorder %s442_s30, %s438_s7  ;;  %p446_p8 = scmp.lt.u32.totalorder %s438_s7, %s662_s25 }
  0xc7   : > { %p440_p7 = pnand %p439_p4, %p721_p9 }
  0xc8   : > { %p445_p3 = por %p444_p1, %p443_p12 }
  0xc9   : > { %p441_p10 = pneg %p440_p7 }
  0xca   : > { %p447_p11 = por %p446_p8, %p445_p3 }
  0xcc   : > { %p448_p0 = pnand %p447_p11, %p441_p10 }
  0xce   : > { %451 = shalt.err (!%p448_p0)
}
  0xcf   : > { %s513_s6 = smov 256   ;;  %s514_s16 = smov 16  }
  0xd0   : > { %328 = dma.vmem_to_hbm [thread:$0]  (%p721_p9), %s657_s18, 512, %s662_s25, %s207_s12, %s513_s6, %s513_s6, %s514_s16  }
  0xd1 PF: > { %s237_s21 = sand.u32 1, %s486_s9   ;;  %p722_p6 = scmp.ne.s32.totalorder %s718_s24, 0 }
  0xd2   : > { %p723_p13 = scmp.ge.s32.totalorder %s506_s14, 2  ;;  %s238_s19 = scalar_lea.sflag [#allocation4], %s237_s21 }
  0xd4   : > { %p335_p2 = pnand %p723_p13, %p722_p6 }
  0xd6   : > { %481 = dma.done.wait (!%p335_p2), %s238_s19, 512  }
  0xd7   : > { %483 = vsyncadd (!%p335_p2), %s238_s19, 4294966784  ;;  %s18_s14 = sadd.s32 1, %s506_s14   ;;  %s724_s9 = smov %s490_s10 }
  0xd8   : > { %p15_p5 = scmp.ge.s32.totalorder %s18_s14, 4   ;;  %s725_s10 = smov %s494_s11 }
  0xd9   : > { %s726_s11 = smov %s586_s23  ;;  %s727_s12 = smov %s502_s13 }
  0xda   : > { %s728_s13 = smov %s730_s17  ;;  %17 = sbr.rel (!%p15_p5) target bundleno = 6 (0x6), region = 73 }
  0xe1   :  { %243 = vsyncpa [#allocation3], 1 }
  0xe2   :  { %245 = vsyncpa [#allocation3 + $0x1], 1 }
  0xe3   :  { %246 = vsyncpa [#allocation4], 1 }
  0xe4   :  { %248 = vsyncpa [#allocation4 + $0x1], 1 }

</bundles_post_ra>
